<compile_context>
chip_gen: v7x
topology: tpu7x:2x2x1
jax: 0.10.0
libtpu: 0.0.40
codegen_flags: <defaults>
</compile_context>

<pallas_src>
import math
import jax
import jax.numpy as jnp
from jax.experimental import pallas as pl
from jax.experimental.pallas import tpu as pltpu

IN_DIMS = 2
D_MODEL = 64
NUM_HEADS = 4  # unused on the default (multi_head=False) forward path


def self_attention_kernel(x_ref, we_ref, wqk_ref, bias_ref, attn_ref, emb_ref):
    # x_ref:    (B*S, IN_DIMS)        flattened input (both batches stacked)
    # we_ref:   (IN_DIMS, D_MODEL)    embedding weight (pre-transposed)
    # wqk_ref:  (D_MODEL, 2*D_MODEL)  fused [W_query^T | W_key^T]
    # bias_ref: (1, 3*D_MODEL)        fused [b_embed | b_query | b_key]
    # attn_ref: (B*S, S)              softmax(q k^T / sqrt(d)), per-batch blocks
    # emb_ref:  (B*S, D_MODEL)        embeddings
    BS = x_ref.shape[0]
    S = attn_ref.shape[1]
    B = BS // S

    x = x_ref[...]                         # (B*S, IN_DIMS)
    we = we_ref[...]                       # (IN_DIMS, D_MODEL)
    bias = bias_ref[...]                   # (1, 3*D_MODEL)
    be = bias[:, :D_MODEL]                 # (1, D_MODEL)
    bqk = bias[:, D_MODEL:]                # (1, 2*D_MODEL)
    inv_scale = 1.0 / math.sqrt(D_MODEL)

    # Embedding: contraction depth is only IN_DIMS=2, so keep it on the VPU as
    # broadcast multiply-adds (a padded MXU matmul would be almost all idle).
    emb = x[:, 0:1] * we[0:1, :]
    for i in range(1, IN_DIMS):
        emb = emb + x[:, i:i + 1] * we[i:i + 1, :]
    emb = emb + be                         # (B*S, D_MODEL)

    # Fused Q|K projection for both batches at once: (B*S, D) @ (D, 2D).
    qk = jnp.dot(emb, wqk_ref[...], preferred_element_type=jnp.float32) + bqk
    q = qk[:, :D_MODEL]                    # (B*S, D_MODEL)
    k = qk[:, D_MODEL:]                    # (B*S, D_MODEL)

    # scores[b, i, j] = q_b[i] . k_b[j]  (contraction over d_model == q @ k.T)
    # Two tiny per-batch dots, stacked to (B*S, S) so the softmax
    # (max / exp / sum / reciprocal) runs once over both batches.
    blocks = []
    for b in range(B):                     # B is tiny and static -> unrolled
        qb = q[b * S:(b + 1) * S, :]
        kb = k[b * S:(b + 1) * S, :]
        blocks.append(jax.lax.dot_general(qb, kb, (((1,), (1,)), ((), ())),
                                          preferred_element_type=jnp.float32))
    scores = jnp.concatenate(blocks, axis=0) * inv_scale    # (B*S, S)

    # TODO(synk): PyTorch casts the attention logits to float64 before the
    # softmax; TPU Pallas has no f64, so the softmax is computed in f32.
    m = jnp.max(scores, axis=-1, keepdims=True)
    e = jnp.exp(scores - m)
    attn = e * pl.reciprocal(jnp.sum(e, axis=-1, keepdims=True), approx=False)

    # NOTE: attn's last dim is S=8 (<128 lanes) -> masked store; acceptable at
    # this size. If S grows, tile the kv axis so the stored last dim is a
    # multiple of 128.
    attn_ref[...] = attn
    emb_ref[...] = emb


def self_attention(x, we, be, wq, bq, wk, bk):
    B, S, in_dims = x.shape

    # Host-side operand fusion (folded/hoisted under jit with constant
    # weights): 7 operands -> 4, fewer prologue DMA descriptors.
    x_flat = x.reshape(B * S, in_dims)                 # free reshape
    wqk = jnp.concatenate([wq, wk], axis=1)            # (D_MODEL, 2*D_MODEL)
    bias = jnp.concatenate([be, bq, bk], axis=1)       # (1, 3*D_MODEL)

    def vmem():
        # Whole-array block resident in VMEM; single ungridded invocation, so
        # no double-buffering / pipeline prologue.
        return pl.BlockSpec(memory_space=pltpu.MemorySpace.VMEM)

    # TODO(synk): on v7x (2 TensorCores) a 2-way "parallel" batch grid axis
    # could engage both cores, but at B=2, S=8 the per-core launch overhead
    # exceeds the compute saved; keep the collapsed single-core form.
    attn_flat, emb_flat = pl.pallas_call(
        self_attention_kernel,
        out_shape=(
            jax.ShapeDtypeStruct((B * S, S), jnp.float32),
            jax.ShapeDtypeStruct((B * S, D_MODEL), jnp.float32),
        ),
        in_specs=[vmem(), vmem(), vmem(), vmem()],
        out_specs=(vmem(), vmem()),
    )(x_flat, we, wqk, bias)

    return attn_flat.reshape(B, S, S), emb_flat.reshape(B, S, D_MODEL)


def _init_linear(key, fan_in, fan_out):
    # Mirrors torch.nn.Linear default init: U(-1/sqrt(fan_in), 1/sqrt(fan_in)).
    kw, kb = jax.random.split(key)
    bound = 1.0 / math.sqrt(fan_in)
    # Stored pre-transposed: (fan_in, fan_out) so y = x @ W + b.
    w = jax.random.uniform(kw, (fan_in, fan_out), jnp.float32, -bound, bound)
    b = jax.random.uniform(kb, (1, fan_out), jnp.float32, -bound, bound)
    return w, b


def _reference(x, we, be, wq, bq, wk, bk):
    emb = x @ we + be
    q = emb @ wq + bq
    k = emb @ wk + bk
    scores = jnp.einsum("bsd,btd->bst", q, k) / math.sqrt(D_MODEL)
    attn = jax.nn.softmax(scores, axis=-1)
    return attn, emb


if __name__ == "__main__":
    key = jax.random.PRNGKey(0)
    k_x, k_e, k_q, k_k = jax.random.split(key, 4)

    B, S = 2, 8
    x = jax.random.normal(k_x, (B, S, IN_DIMS), jnp.float32)

    we, be = _init_linear(k_e, IN_DIMS, D_MODEL)
    wq, bq = _init_linear(k_q, D_MODEL, D_MODEL)
    wk, bk = _init_linear(k_k, D_MODEL, D_MODEL)

    attn, emb = self_attention(x, we, be, wq, bq, wk, bk)
    jax.block_until_ready((attn, emb))

    attn_ref, emb_ref = _reference(x, we, be, wq, bq, wk, bk)
    assert attn.shape == (B, S, S) and emb.shape == (B, S, D_MODEL)
    assert jnp.allclose(attn, attn_ref, atol=1e-5, rtol=1e-5)
    assert jnp.allclose(emb, emb_ref, atol=1e-5, rtol=1e-5)

    print("KERNEL_OK")
</pallas_src>

<mosaic_0001>
module attributes {stable_mosaic.version = 11 : i64} {
  func.func @self_attention_kernel(%arg0: memref<16x2xf32, #tpu.memory_space<vmem>>, %arg1: memref<2x64xf32, #tpu.memory_space<vmem>>, %arg2: memref<64x128xf32, #tpu.memory_space<vmem>>, %arg3: memref<1x192xf32, #tpu.memory_space<vmem>>, %arg4: memref<16x8xf32, #tpu.memory_space<vmem>>, %arg5: memref<16x64xf32, #tpu.memory_space<vmem>>) attributes {dimension_semantics = [], scalar_prefetch = 0 : i64, scratch_operands = 0 : i64, tpu.core_type = #tpu.core_type<tc>} {
    %c0 = arith.constant 0 : index
    %c0_0 = arith.constant 0 : index
    %0 = vector.load %arg0[%c0, %c0_0] : memref<16x2xf32, #tpu.memory_space<vmem>>, vector<16x2xf32>
    %c0_1 = arith.constant 0 : index
    %c0_2 = arith.constant 0 : index
    %1 = vector.load %arg1[%c0_1, %c0_2] : memref<2x64xf32, #tpu.memory_space<vmem>>, vector<2x64xf32>
    %c0_3 = arith.constant 0 : index
    %c0_4 = arith.constant 0 : index
    %2 = vector.load %arg3[%c0_3, %c0_4] : memref<1x192xf32, #tpu.memory_space<vmem>>, vector<1x192xf32>
    %3 = vector.extract_strided_slice %2 {offsets = [0, 0], sizes = [1, 64], strides = [1, 1]} : vector<1x192xf32> to vector<1x64xf32>
    %4 = vector.extract_strided_slice %2 {offsets = [0, 64], sizes = [1, 128], strides = [1, 1]} : vector<1x192xf32> to vector<1x128xf32>
    %5 = vector.extract_strided_slice %0 {offsets = [0, 0], sizes = [16, 1], strides = [1, 1]} : vector<16x2xf32> to vector<16x1xf32>
    %6 = vector.extract_strided_slice %1 {offsets = [0, 0], sizes = [1, 64], strides = [1, 1]} : vector<2x64xf32> to vector<1x64xf32>
    %7 = vector.broadcast %5 : vector<16x1xf32> to vector<16x64xf32>
    %8 = vector.broadcast %6 : vector<1x64xf32> to vector<16x64xf32>
    %9 = arith.mulf %7, %8 : vector<16x64xf32>
    %10 = vector.extract_strided_slice %0 {offsets = [0, 1], sizes = [16, 1], strides = [1, 1]} : vector<16x2xf32> to vector<16x1xf32>
    %11 = vector.extract_strided_slice %1 {offsets = [1, 0], sizes = [1, 64], strides = [1, 1]} : vector<2x64xf32> to vector<1x64xf32>
    %12 = vector.broadcast %10 : vector<16x1xf32> to vector<16x64xf32>
    %13 = vector.broadcast %11 : vector<1x64xf32> to vector<16x64xf32>
    %14 = arith.mulf %12, %13 : vector<16x64xf32>
    %15 = arith.addf %9, %14 : vector<16x64xf32>
    %16 = vector.broadcast %3 : vector<1x64xf32> to vector<16x64xf32>
    %17 = arith.addf %15, %16 : vector<16x64xf32>
    %c0_5 = arith.constant 0 : index
    %c0_6 = arith.constant 0 : index
    %18 = vector.load %arg2[%c0_5, %c0_6] : memref<64x128xf32, #tpu.memory_space<vmem>>, vector<64x128xf32>
    %cst = arith.constant dense<0.000000e+00> : vector<16x128xf32>
    %19 = tpu.matmul %17, %18, %cst {dimension_numbers = #tpu.dot_dimension_numbers<[1], [0], [0], [1], [0, 0, 1, 1], [], []>} : vector<16x64xf32>, vector<64x128xf32>, vector<16x128xf32> -> vector<16x128xf32>
    %20 = vector.broadcast %4 : vector<1x128xf32> to vector<16x128xf32>
    %21 = arith.addf %19, %20 : vector<16x128xf32>
    %22 = vector.extract_strided_slice %21 {offsets = [0, 0], sizes = [16, 64], strides = [1, 1]} : vector<16x128xf32> to vector<16x64xf32>
    %23 = vector.extract_strided_slice %21 {offsets = [0, 64], sizes = [16, 64], strides = [1, 1]} : vector<16x128xf32> to vector<16x64xf32>
    %24 = vector.extract_strided_slice %22 {offsets = [0, 0], sizes = [8, 64], strides = [1, 1]} : vector<16x64xf32> to vector<8x64xf32>
    %25 = vector.extract_strided_slice %23 {offsets = [0, 0], sizes = [8, 64], strides = [1, 1]} : vector<16x64xf32> to vector<8x64xf32>
    %cst_7 = arith.constant dense<0.000000e+00> : vector<8x8xf32>
    %26 = tpu.matmul %24, %25, %cst_7 {dimension_numbers = #tpu.dot_dimension_numbers<[1], [1], [0], [0], [0, 0, 1, 0], [], []>} : vector<8x64xf32>, vector<8x64xf32>, vector<8x8xf32> -> vector<8x8xf32>
    %27 = vector.extract_strided_slice %22 {offsets = [8, 0], sizes = [8, 64], strides = [1, 1]} : vector<16x64xf32> to vector<8x64xf32>
    %28 = vector.extract_strided_slice %23 {offsets = [8, 0], sizes = [8, 64], strides = [1, 1]} : vector<16x64xf32> to vector<8x64xf32>
    %cst_8 = arith.constant dense<0.000000e+00> : vector<8x8xf32>
    %29 = tpu.matmul %27, %28, %cst_8 {dimension_numbers = #tpu.dot_dimension_numbers<[1], [1], [0], [0], [0, 0, 1, 0], [], []>} : vector<8x64xf32>, vector<8x64xf32>, vector<8x8xf32> -> vector<8x8xf32>
    %30 = tpu.concatenate %26, %29 in 0 : vector<8x8xf32>, vector<8x8xf32> -> vector<16x8xf32>
    %cst_9 = arith.constant 1.250000e-01 : f32
    %31 = vector.broadcast %cst_9 : f32 to vector<16x8xf32>
    %32 = arith.mulf %30, %31 : vector<16x8xf32>
    %cst_10 = arith.constant dense<0xFF800000> : vector<16xf32>
    %33 = vector.multi_reduction <maximumf>, %32, %cst_10 [1] : vector<16x8xf32> to vector<16xf32>
    %34 = vector.shape_cast %33 : vector<16xf32> to vector<16x1xf32>
    %35 = vector.broadcast %34 : vector<16x1xf32> to vector<16x8xf32>
    %36 = arith.subf %32, %35 : vector<16x8xf32>
    %37 = math.exp %36 : vector<16x8xf32>
    %cst_11 = arith.constant dense<0.000000e+00> : vector<16xf32>
    %38 = vector.multi_reduction <add>, %37, %cst_11 [1] : vector<16x8xf32> to vector<16xf32>
    %39 = vector.shape_cast %38 : vector<16xf32> to vector<16x1xf32>
    %40 = tpu.reciprocal %39 : vector<16x1xf32> -> vector<16x1xf32>
    %41 = vector.broadcast %40 : vector<16x1xf32> to vector<16x8xf32>
    %42 = arith.mulf %37, %41 : vector<16x8xf32>
    %c0_12 = arith.constant 0 : index
    %c0_13 = arith.constant 0 : index
    %43 = vector.load %arg4[%c0_12, %c0_13] : memref<16x8xf32, #tpu.memory_space<vmem>>, vector<16x8xf32>
    tpu.vector_store %arg4[%c0_12, %c0_13], %42 {strides = array<i32>} : memref<16x8xf32, #tpu.memory_space<vmem>>, vector<16x8xf32>,
    %c0_14 = arith.constant 0 : index
    %c0_15 = arith.constant 0 : index
    %44 = vector.load %arg5[%c0_14, %c0_15] : memref<16x64xf32, #tpu.memory_space<vmem>>, vector<16x64xf32>
    tpu.vector_store %arg5[%c0_14, %c0_15], %17 {strides = array<i32>} : memref<16x64xf32, #tpu.memory_space<vmem>>, vector<16x64xf32>,
    return
  }
}

</mosaic_0001>

<bundles_post_ra>
// kernel: tpu_custom_call.1
= control target key start
LH: loop header
LB: loop body
LE: loop exit
PB: predicated region body
PF: predicated region fallthrough
CT: control target
= control target key end

     0   :  { %11 = vsyncpa [#allocation3], 0  ;;  %s624_s0 = inlined_call_operand.vmem [shape: f32[16,2], index: 0, kind: input, shape index: {}]   ;;  %s625_s1 = inlined_call_operand.vmem [shape: f32[2,64], index: 1, kind: input, shape index: {}]   ;;  %s626_s2 = inlined_call_operand.hbm [shape: f32[64,128], index: 2, kind: input, shape index: {}]   ;;  %s627_s3 = inlined_call_operand.vmem [shape: f32[1,192], index: 3, kind: input, shape index: {}]   ;;  %s628_s4 = inlined_call_operand.vmem [shape: f32[16,8], index: 4, kind: output, shape index: {0}]   ;;  %s629_s5 = inlined_call_operand.hbm [shape: f32[16,64], index: 5, kind: output, shape index: {1}]  }
   0x1   :  { %12 = vsyncpa [#allocation4], 0  ;;  %s516_s18 = smov [#allocation2]   ;;  %s468_s22 = scalar_lea.hbm %s626_s2, 1024 }
   0x2   :  { %s22_s19 = sshll.u32 %s516_s18, 4  ;;  %p469_p0 = scmp.ne.s32.totalorder %s626_s2, %s468_s22  ;;  %s23_s19 = int_to_ptr.vmem [resolvable:$true] %s22_s19 }
   0x3   :  { %p472_p1 = scmp.lt.u32.totalorder %s468_s22, %s626_s2 }
   0x5   :  { %p474_p2 = pnand %p472_p1, %p469_p0 }
   0x7   :  { %477 = shalt.err (!%p474_p2)
}
   0x8   :  { %s478_s27 = scalar_lea.vmem %s23_s19, 1024  ;;  %p483_p4 = scmp.lt.s32.totalorder %s23_s19, %s23_s19 }
   0x9   :  { %p479_p3 = scmp.ne.s32.totalorder %s23_s19, %s478_s27  ;;  %p484_p5 = scmp.lt.s32.totalorder %s478_s27, %s478_s27 }
   0xb   :  { %p485_p6 = por %p484_p5, %p483_p4 }
   0xd   :  { %p486_p7 = pnand %p485_p6, %p479_p3 }
   0xf   :  { %489 = shalt.err (!%p486_p7)
}
  0x10   :  { %s517_s28 = smov 128   ;;  %s518_s29 = smov 8  }
  0x11   :  { %28 = dma.hbm_to_vmem [thread:$0]  %s626_s2, 1024, %s23_s19, [#allocation3], %s517_s28, %s517_s28, %s518_s29  }
  0x12   :  { %512 = dma.done.wait [#allocation3], 1024  }
  0x13   :  { %513 = vsyncadd [#allocation3], 4294966272  ;;  %v519_v0 = vmov 0   ;;  %v35_v1 = vld [vmem:[%s624_s0 + $0x8] sm:$0xff]  ;;  %v34_v2 = vld [vmem:[%s624_s0] sm:$0xff]  ;;  %v48_v6 = vlaneseq  ;;  %v520_v10 = vmov 1  }
  0x14   :  { %458 = vset.pattern.permute.xlu1 %v519_v0  ;;  %456 = vset.pattern.permute.xlu0 %v519_v0  ;;  %v78_v3 = vld [vmem:[#allocation2] sm:$0xff]  ;;  %v79_v4 = vld [vmem:[#allocation2 + $0x8] sm:$0xff]  ;;  %v80_v7 = vld [vmem:[#allocation2 + $0x10] sm:$0xff]  ;;  %s521_s11 = smov 64   ;;  %vm94_vm0 = vcmask 523264   ;;  %v522_v38 = vmov 0.0  }
  0x15   :  { %45 = vperm.xlu1 %458, %v35_v1   ;;  %40 = vperm.xlu0 %456, %v34_v2   ;;  %v431_v5 = vpack.c.bf16 %v79_v4, %v78_v3  ;;  %v81_v8 = vld [vmem:[#allocation2 + $0x18] sm:$0xff]  ;;  %v82_v11 = vld [vmem:[#allocation2 + $0x20] sm:$0xff]  ;;  %v83_v12 = vld [vmem:[#allocation2 + $0x28] sm:$0xff]  ;;  %v49_v13 = vshrl.u32 %v48_v6, 7  ;;  %vm523_vm1 = vmmov 0   ;;  %vm334_vm2 = vcmask 64512  }
  0x16   :  { %v435_v9 = vpack.c.bf16 %v81_v8, %v80_v7  ;;  %v439_v14 = vpack.c.bf16 %v83_v12, %v82_v11  ;;  %v37_v15 = vld [vmem:[%s627_s3] sm:$0x3]  ;;  %v84_v16 = vld [vmem:[#allocation2 + $0x30] sm:$0xff]  ;;  %v85_v17 = vld [vmem:[#allocation2 + $0x38] sm:$0xff]  ;;  %421 = vmatprep.subr.mxu1 %v522_v38  ;;  %423 = vmatprep.mubr.msk.f32.mxu1 %vm523_vm1, %v522_v38 }
  0x17   :  { %432 = vmatprep.subr.bf16.mxu0 %v431_v5  ;;  %v50_v18 = vsub.s32 0, %v49_v13  ;;  %v64_v19 = vsub.s32 1, %v49_v13  ;;  %v443_v21 = vpack.c.bf16 %v85_v17, %v84_v16  ;;  %v36_v23 = vld [vmem:[%s625_s1] sm:$0x3]  ;;  %s524_s1 = smov [#allocation5]  }
  0x18   :  { %434 = vmatpush3.bf16.msra.mxu0 %v431_v5  ;;  %s368_s3 = sshll.u32 %s524_s1, 4  ;;  %s369_s3 = int_to_ptr.vmem [resolvable:$true] %s368_s3 }
  0x19   :  { %459 = vset.pattern.permute.xlu1 %v520_v10  ;;  %457 = vset.pattern.permute.xlu0 %v520_v10  ;;  %v74_v20 = vrot.slane %v37_v15, %v50_v18  ;;  %v89_v22 = vrot.slane %v37_v15, %v64_v19  ;;  %v51_v26 = vrot.slane %v36_v23, %v50_v18  ;;  %s490_s14 = scalar_lea.vmem %s369_s3, 256  ;;  %p495_p9 = scmp.lt.s32.totalorder %s369_s3, %s369_s3 }
  0x1a   :  { %59 = vperm.xlu1 %459, %v35_v1   ;;  %55 = vperm.xlu0 %457, %v34_v2   ;;  %v65_v27 = vrot.slane %v36_v23, %v64_v19  ;;  %p491_p8 = scmp.ne.s32.totalorder %s369_s3, %s490_s14  ;;  %p496_p10 = scmp.lt.s32.totalorder %s490_s14, %s490_s14 }
  0x1b   :  { %436 = vmatprep.subr.bf16.mxu0 %v435_v9 }
  0x1c   :  { %438 = vmatpush3.bf16.msra.mxu0 %v435_v9  ;;  %p497_p11 = por %p496_p10, %p495_p9 }
  0x1d   :  { %440 = vmatprep.subr.bf16.mxu0 %v439_v14 }
  0x1e   :  { %90 = vrot.lane.b32.xlu1 %v74_v20, %s521_s11  ;;  %92 = vrot.lane.b32.xlu0 %v89_v22, %s521_s11  ;;  %p498_p12 = pnand %p497_p11, %p491_p8 }
  0x20   :  { %442 = vmatpush3.bf16.msra.mxu0 %v439_v14 }
  0x21   :  { %444 = vmatprep.subr.bf16.mxu0 %v443_v21 }
  0x24   :  { %446 = vmatpush3.bf16.msra.mxu0 %v443_v21 }
  0x94   :  { %v41_v24 = vpop.permute.xlu0 %40  ;;  %v46_v25 = vpop.permute.xlu1 %45 }
  0x95   :  { %v52_v30 = vmul.f32 %v51_v26, %v41_v24  ;;  %v53_v31 = vmul.f32 %v51_v26, %v46_v25 }
  0x99   :  { %v60_v28 = vpop.permute.xlu1 %59  ;;  %v56_v29 = vpop.permute.xlu0 %55 }
  0x9a   :  { %v67_v32 = vmul.f32 %v65_v27, %v60_v28  ;;  %v66_v33 = vmul.f32 %v65_v27, %v56_v29 }
  0x9c   :  { %v69_v34 = vadd.f32 %v67_v32, %v53_v31  ;;  %v68_v35 = vadd.f32 %v66_v33, %v52_v30 }
  0x9d   :  { %v91_v39 = vpop.permute.xlu1 %90  ;;  %v93_v40 = vpop.permute.xlu0 %92 }
  0x9e   :  { %v77_v36 = vadd.f32 %v74_v20, %v69_v34  ;;  %v76_v37 = vadd.f32 %v74_v20, %v68_v35  ;;  %v95_v41 = vsel %vm94_vm0, %v91_v39, %v93_v40 }
  0xa0   :  { %418 = vmatprep.mubr.msk.f32.mxu0 %vm94_vm0, %v76_v37  ;;  %359 = vst.msk [vmem:[#allocation5] sm:$0xff] %vm94_vm0, %v76_v37  ;;  %360 = vst.msk [vmem:[#allocation5 + $0x8] sm:$0xff] %vm94_vm0, %v77_v36 }
  0xa1   :  { %419 = vmatmul.mubr.msk.f32.vlgmr.msra.gmra.mrb[0].mxu0 %vm94_vm0, %v77_v36 }
 0x174   :  { %v420_v42 = vpop.f32.mrb[0].mxu0 }
 0x175   :  { %v175_v43 = vadd.f32 %v420_v42, %v95_v41  ;;  %v169_v44 = vpop.f32.mrb[1].mxu0 }
 0x176   :  { %v170_v45 = vadd.f32 %v169_v44, %v95_v41 }
 0x177   :  { %256 = vrot.lane.b32.xlu0 %v175_v43, %s521_s11 }
 0x178   :  { %179 = vrot.lane.b32.xlu1 %v170_v45, %s521_s11 }
 0x1e9   :  { %v257_v47 = vpop.permute.xlu0 %256 }
 0x1ea   :  { %v180_v46 = vpop.permute.xlu1 %179 }
 0x1eb   :  { %422 = vmatpush3.xpose.msk.msra.mxu1 %vm94_vm0, %v180_v46 }
 0x1ec   :  { %426 = vmatprep.subr.mxu1 %v522_v38 }
 0x1ee   :  { %424 = vmatmul.mubr.msk.f32.vlgmr.msra.gmra.mrb[0].mxu1 %vm94_vm0, %v170_v45 }
 0x1ef   :  { %427 = vmatpush3.xpose.msk.msra.mxu1 %vm94_vm0, %v257_v47  ;;  %428 = vmatprep.mubr.msk.f32.mxu1 %vm523_vm1, %v522_v38 }
 0x1f2   :  { %429 = vmatmul.mubr.msk.f32.vlgmr.msra.gmra.mrb[2].mxu1 %vm94_vm0, %v175_v43 }
 0x2c1   :  { %v251_v48 = vpop.f32.mrb[0].mxu1 }
 0x2c2   :  { %v332_v49 = vmul.f32 0.125, %v251_v48  ;;  %v425_v50 = vpop.f32.mrb[1].mxu1 }
 0x2c4   :  { %v335_v51 = vsel %vm334_vm2, %v332_v49, -inf }
 0x2c5   :  { %336 = vmax.xlane.f32.xlu1 %v335_v51  ;;  %v328_v52 = vpop.f32.mrb[2].mxu1 }
 0x2c6   :  { %v333_v53 = vmul.f32 0.125, %v328_v52  ;;  %v430_v54 = vpop.f32.mrb[3].mxu1 }
 0x2c8   :  { %v338_v55 = vsel %vm334_vm2, %v333_v53, -inf }
 0x2c9   :  { %339 = vmax.xlane.f32.xlu0 %v338_v55 }
 0x352   :  { %v337_v56 = vpop.xlane.xlu1 %336 }
 0x353   :  { %v341_v57 = vsub.f32 %v332_v49, %v337_v56 }
 0x355   :  { %v343_v58 = vmul.f32 1.442695, %v341_v57 }
 0x356   :  { %v340_v59 = vpop.xlane.xlu0 %339 }
 0x357   :  { %460 = vpow2.f32 %v343_v58  ;;  %v342_v60 = vsub.f32 %v333_v53, %v340_v59 }
 0x359   :  { %v345_v61 = vmul.f32 1.442695, %v342_v60 }
 0x35b   :  { %462 = vpow2.f32 %v345_v61 }
 0x361   :  { %v461_v62 = vpop.eup %460 }
 0x362   :  { %v347_v63 = vsel %vm334_vm2, %v461_v62, 0.0 }
 0x363   :  { %348 = vadd.xlane.f32.xlu0 %v347_v63 }
 0x365   :  { %v463_v0 = vpop.eup %462 }
 0x366   :  { %v350_v1 = vsel %vm334_vm2, %v463_v0, 0.0 }
 0x367   :  { %351 = vadd.xlane.f32.xlu1 %v350_v1 }
 0x368   :  { %501 = shalt.err (!%p498_p12)
}
 0x369   :  { %s502_s17 = scalar_lea.hbm %s629_s5, 256 }
 0x36a   :  { %p503_p13 = scmp.ne.s32.totalorder %s629_s5, %s502_s17  ;;  %p506_p0 = scmp.lt.u32.totalorder %s502_s17, %s629_s5 }
 0x36c   :  { %p508_p1 = pnand %p506_p0, %p503_p13 }
 0x36e   :  { %511 = shalt.err (!%p508_p1)
}
 0x36f   :  { %374 = dma.vmem_to_hbm [thread:$0]  %s369_s3, 256, %s629_s5, [#allocation4], %s517_s28, %s517_s28, %s518_s29  }
 0x3f0   :  { %v349_v2 = vpop.xlane.xlu0 %348 }
 0x3f1   :  { %464 = vrcp.f32 %v349_v2 }
 0x3f4   :  { %v352_v3 = vpop.xlane.xlu1 %351 }
 0x3f5   :  { %466 = vrcp.f32 %v352_v3 }
 0x3fb   :  { %v465_v4 = vpop.eup %464 }
 0x3fc   :  { %v355_v5 = vmul.f32 %v465_v4, %v461_v62 }
 0x3fe   :  { %357 = vst.msk [vmem:[%s628_s4] sm:$0xff] %vm334_vm2, %v355_v5 }
 0x3ff   :  { %v467_v6 = vpop.eup %466 }
 0x400   :  { %v356_v7 = vmul.f32 %v467_v6, %v463_v0 }
 0x402   :  { %358 = vst.msk [vmem:[%s628_s4 + $0x8] sm:$0xff] %vm334_vm2, %v356_v7 }
 0x403   :  { %514 = dma.done.wait [#allocation4], 256  }
 0x404   :  { %515 = vsyncadd [#allocation4], 4294967040 }
 0x405   :  { %380 = vsyncpa [#allocation3], 1 }
 0x406   :  { %381 = vsyncpa [#allocation4], 1 }

</bundles_post_ra>
